<compile_context>
chip_gen: v6e
topology: v6e:2x2x1
jax: 0.10.0
libtpu: 0.0.40
codegen_flags: <defaults>
</compile_context>

<pallas_src>
import jax
import jax.numpy as jnp
from jax.experimental import pallas as pl
from jax.experimental.pallas import tpu as pltpu


# ----------------------------- helpers -----------------------------

def _pick_tile(n, candidates):
    for c in candidates:
        if c <= n and n % c == 0:
            return c
    return n


def _silu_f32(x):
    return x * (1.0 / (1.0 + jnp.exp(-jnp.clip(x, -30.0, 30.0))))


def _layernorm_f32(xv, g_ref, b_ref, eps):
    mu = jnp.mean(xv, axis=1, keepdims=True)
    var = jnp.mean((xv - mu) ** 2, axis=1, keepdims=True)
    return (xv - mu) * jax.lax.rsqrt(var + eps) * g_ref[...] + b_ref[...]


# ----------------------------- tiled matmul -----------------------------

def pallas_matmul(x, w, b=None, *, pre_silu=False, residual=None,
                  out_dtype=jnp.bfloat16):
    """out = (SiLU(x) if pre_silu else x) @ w [+ b] [+ residual]."""
    M, K = x.shape
    K2, N = w.shape
    assert K == K2
    tm = _pick_tile(M, (512, 256, 128, 64, 32, 16, 8))
    tn = _pick_tile(N, (512, 256, 128))
    tk = _pick_tile(K, (256, 512, 128))          # prefer 256 (v5e MXU depth)
    gm, gn, gk = M // tm, N // tn, K // tk

    has_b = b is not None
    has_r = residual is not None

    inputs = [x.astype(jnp.bfloat16), w.astype(jnp.bfloat16)]
    in_specs = [pl.BlockSpec((tm, tk), lambda i, j, k: (i, k)),
                pl.BlockSpec((tk, tn), lambda i, j, k: (k, j))]
    if has_b:
        inputs.append(b.reshape(1, N).astype(jnp.float32))
        in_specs.append(pl.BlockSpec((1, tn), lambda i, j, k: (0, j)))
    if has_r:
        inputs.append(residual.astype(jnp.bfloat16))
        in_specs.append(pl.BlockSpec((tm, tn), lambda i, j, k: (i, j)))

    def kernel(*refs):
        x_ref, w_ref = refs[0], refs[1]
        pos = 2
        b_ref = refs[pos] if has_b else None
        pos += int(has_b)
        r_ref = refs[pos] if has_r else None
        pos += int(has_r)
        o_ref = refs[pos]
        acc_ref = refs[pos + 1]
        k_id = pl.program_id(2)

        @pl.when(k_id == 0)
        def _():
            acc_ref[...] = jnp.zeros_like(acc_ref)

        xv = x_ref[...]
        if pre_silu:
            xv = _silu_f32(xv.astype(jnp.float32)).astype(jnp.bfloat16)
        acc_ref[...] += jnp.dot(xv, w_ref[...],
                                preferred_element_type=jnp.float32)

        @pl.when(k_id == pl.num_programs(2) - 1)
        def _():
            r = acc_ref[...]
            if has_b:
                r = r + b_ref[...]
            if has_r:
                r = r + r_ref[...].astype(jnp.float32)
            o_ref[...] = r.astype(o_ref.dtype)

    return pl.pallas_call(
        kernel,
        out_shape=jax.ShapeDtypeStruct((M, N), out_dtype),
        grid=(gm, gn, gk),
        in_specs=in_specs,
        out_specs=pl.BlockSpec((tm, tn), lambda i, j, k: (i, j)),
        scratch_shapes=[pltpu.VMEM((tm, tn), jnp.float32)],
        compiler_params=pltpu.CompilerParams(
            dimension_semantics=("parallel", "parallel", "arbitrary")),
    )(*inputs)


# ----------------------- packed projection (+fused LN) -----------------------

def pallas_proj_packed(x, w_stack, *, ln=None, eps=1e-5):
    """out[s] = LN(x) @ w_stack[s]   (LN optional, computed in f32 prologue).

    x: (M, K), w_stack: (S, K, N) -> (S, M, N) bf16.  Avoids writing a packed
    (M, S*N) buffer that would need XLA slicing downstream.
    """
    M, K = x.shape
    S, K2, N = w_stack.shape
    assert K == K2
    tm = _pick_tile(M, (256, 128, 64, 32, 16, 8))
    tn = _pick_tile(N, (512, 256, 128))
    has_ln = ln is not None

    inputs = [x.astype(jnp.bfloat16), w_stack.astype(jnp.bfloat16)]
    in_specs = [pl.BlockSpec((tm, K), lambda s, i, j: (i, 0)),
                pl.BlockSpec((1, K, tn), lambda s, i, j: (s, 0, j))]
    if has_ln:
        g, b = ln
        inputs += [g.reshape(1, K).astype(jnp.float32),
                   b.reshape(1, K).astype(jnp.float32)]
        in_specs += [pl.BlockSpec((1, K), lambda s, i, j: (0, 0)),
                     pl.BlockSpec((1, K), lambda s, i, j: (0, 0))]

    def kernel(*refs):
        x_ref, w_ref = refs[0], refs[1]
        pos = 2
        if has_ln:
            lg_ref, lb_ref = refs[2], refs[3]
            pos = 4
        o_ref = refs[pos]
        xv = x_ref[...].astype(jnp.float32)
        if has_ln:
            xv = _layernorm_f32(xv, lg_ref, lb_ref, eps)
        o_ref[0] = jnp.dot(xv.astype(jnp.bfloat16), w_ref[0],
                           preferred_element_type=jnp.float32).astype(o_ref.dtype)

    return pl.pallas_call(
        kernel,
        out_shape=jax.ShapeDtypeStruct((S, M, N), jnp.bfloat16),
        grid=(S, M // tm, N // tn),
        in_specs=in_specs,
        out_specs=pl.BlockSpec((1, tm, tn), lambda s, i, j: (s, i, j)),
        compiler_params=pltpu.CompilerParams(
            dimension_semantics=("parallel", "parallel", "parallel")),
    )(*inputs)


# ----------------------------- convolutions -----------------------------

def conv2d_1x1(x, w, b, *, residual=None):
    """x: (B, HW, Cin) -> (B, HW, Cout).  w: (Cout, Cin[,1,1])."""
    B, HW, Cin = x.shape
    Cout = w.shape[0]
    wm = w.reshape(Cout, Cin).T
    res = residual.reshape(B * HW, Cout) if residual is not None else None
    out = pallas_matmul(x.reshape(B * HW, Cin), wm, b, residual=res)
    return out.reshape(B, HW, Cout)


def conv2d_3x3(x, w, b, H, W, *, time_add=None, residual=None):
    """3x3 / stride 1 / pad 1 conv on NHWC-flattened input.

    x: (B, H*W, Cin)  w: (Cout, Cin, 3, 3)  b: (Cout,)
    time_add: optional (B, Cout) added per batch/channel (time embedding).
    residual: optional (B, H*W, Cout) added in the epilogue.

    Grid = (B, Cout-tiles).  The zero-padded image lives in a persistent VMEM
    scratch filled once per batch item (no XLA pad, no im2col).  The 9 taps are
    shifted matmuls; the horizontal-wrap mask is built in-kernel from an iota
    and applied to the (HW, tCout) matmul result (skipped for dx == 0).
    """
    B, HW, Cin = x.shape
    assert HW == H * W
    Cout = w.shape[0]
    pad = W + 1
    HWp = HW + 2 * pad
    tco = _pick_tile(Cout, (512, 256, 128))
    gj = Cout // tco

    wk = jnp.transpose(w, (2, 3, 1, 0)).reshape(9, Cin, Cout).astype(jnp.bfloat16)
    b2 = b.reshape(1, Cout).astype(jnp.float32)
    offs = tuple((ky - 1) * W + (kx - 1) for ky in range(3) for kx in range(3))
    dxs = tuple(kx - 1 for ky in range(3) for kx in range(3))

    has_t = time_add is not None
    has_r = residual is not None

    inputs = [x.astype(jnp.bfloat16), wk, b2]
    in_specs = [pl.BlockSpec((1, HW, Cin), lambda bi, j: (bi, 0, 0)),
                pl.BlockSpec((9, Cin, tco), lambda bi, j: (0, 0, j)),
                pl.BlockSpec((1, tco), lambda bi, j: (0, j))]
    if has_t:
        inputs.append(time_add.astype(jnp.float32))
        in_specs.append(pl.BlockSpec((1, tco), lambda bi, j: (bi, j)))
    if has_r:
        inputs.append(residual.astype(jnp.bfloat16))
        in_specs.append(pl.BlockSpec((1, HW, tco), lambda bi, j: (bi, 0, j)))

    def kernel(*refs):
        x_ref, w_ref, b_ref = refs[:3]
        pos = 3
        t_ref = refs[pos] if has_t else None
        pos += int(has_t)
        r_ref = refs[pos] if has_r else None
        pos += int(has_r)
        o_ref, pad_ref = refs[pos], refs[pos + 1]

        # Fill the zero-padded image scratch once per batch item (j == 0);
        # it persists across the Cout tiles of the same batch item.
        @pl.when(pl.program_id(1) == 0)
        def _():
            pad_ref[...] = jnp.zeros_like(pad_ref)
            pad_ref[pl.ds(pad, HW), :] = x_ref[0]

        col = jax.lax.broadcasted_iota(jnp.int32, (HW, 1), 0) % W
        acc = None
        # TODO(synk): for real SD sizes (HW=4096), tile HW with a +/-(W+1) halo
        # via manual make_async_copy so the scratch/accumulator fit v7x VMEM.
        for k in range(9):
            patch = pad_ref[pl.ds(pad + offs[k], HW), :]
            contrib = jnp.dot(patch, w_ref[k], preferred_element_type=jnp.float32)
            dx = dxs[k]
            if dx != 0:
                valid = (col + dx >= 0) & (col + dx < W)
                contrib = jnp.where(valid, contrib, 0.0)
            acc = contrib if acc is None else acc + contrib
        acc = acc + b_ref[...]
        if has_t:
            acc = acc + t_ref[...]
        if has_r:
            acc = acc + r_ref[0].astype(jnp.float32)
        o_ref[0] = acc.astype(o_ref.dtype)

    return pl.pallas_call(
        kernel,
        out_shape=jax.ShapeDtypeStruct((B, HW, Cout), jnp.bfloat16),
        grid=(B, gj),
        in_specs=in_specs,
        out_specs=pl.BlockSpec((1, HW, tco), lambda bi, j: (bi, 0, j)),
        scratch_shapes=[pltpu.VMEM((HWp, Cin), jnp.bfloat16)],
        compiler_params=pltpu.CompilerParams(
            dimension_semantics=("parallel", "arbitrary")),
    )(*inputs)


# ----------------------------- group norm -----------------------------

def pallas_groupnorm(x, gamma, beta, *, eps, num_groups=32, silu=False):
    """GroupNorm (+ optional fused SiLU) on NHWC-flattened x: (B, HW, C)."""
    B, HW, C = x.shape
    G = num_groups
    Cg = C // G
    m = (jnp.arange(C)[:, None] // Cg == jnp.arange(G)[None, :]).astype(jnp.float32)
    mt = m.T
    g2 = gamma.reshape(1, C).astype(jnp.float32)
    b2 = beta.reshape(1, C).astype(jnp.float32)
    cnt = float(HW * Cg)

    # TODO(synk): two-pass HW-tiled stats for real SD sizes (HW=4096, C>=640).
    def kernel(x_ref, g_ref, be_ref, m_ref, mt_ref, o_ref):
        xv = x_ref[0].astype(jnp.float32)                        # (HW, C)
        s1 = jnp.sum(xv, axis=0, keepdims=True)                  # (1, C)
        s2 = jnp.sum(xv * xv, axis=0, keepdims=True)
        mean_g = jnp.dot(s1, m_ref[...], preferred_element_type=jnp.float32) / cnt
        msq_g = jnp.dot(s2, m_ref[...], preferred_element_type=jnp.float32) / cnt
        var_g = msq_g - mean_g * mean_g
        mean_c = jnp.dot(mean_g, mt_ref[...], preferred_element_type=jnp.float32)
        var_c = jnp.dot(var_g, mt_ref[...], preferred_element_type=jnp.float32)
        y = (xv - mean_c) * jax.lax.rsqrt(var_c + eps)
        y = y * g_ref[...] + be_ref[...]
        if silu:
            y = _silu_f32(y)
        o_ref[0] = y.astype(o_ref.dtype)

    return pl.pallas_call(
        kernel,
        out_shape=jax.ShapeDtypeStruct((B, HW, C), jnp.bfloat16),
        grid=(B,),
        in_specs=[pl.BlockSpec((1, HW, C), lambda i: (i, 0, 0)),
                  pl.BlockSpec((1, C), lambda i: (0, 0)),
                  pl.BlockSpec((1, C), lambda i: (0, 0)),
                  pl.BlockSpec((C, G), lambda i: (0, 0)),
                  pl.BlockSpec((G, C), lambda i: (0, 0))],
        out_specs=pl.BlockSpec((1, HW, C), lambda i: (i, 0, 0)),
        compiler_params=pltpu.CompilerParams(dimension_semantics=("parallel",)),
    )(x.astype(jnp.bfloat16), g2, b2, m, mt)


# ----------------------------- attention -----------------------------

def pallas_attention(q_arr, k_arr, v_arr, qi, ki, vi, n_heads=8):
    """Multi-head attention; q/k/v come as packed (S, B, L, dim) buffers and the
    leading index (qi/ki/vi) selects the role, so no XLA slicing is needed.
    Per-head outputs are stored directly into o_ref (no concatenate)."""
    _, B, Lq, dim = q_arr.shape
    Lk = k_arr.shape[2]
    d = dim // n_heads
    scale = d ** (-0.5)

    # TODO(synk): flash-style kv tiling (online softmax) for self-attention at
    # real SD resolutions; here the full (Lq, Lk) scores fit VMEM.
    def kernel(q_ref, k_ref, v_ref, o_ref):
        qv = q_ref[0, 0].astype(jnp.float32) * scale   # (Lq, dim)
        kv = k_ref[0, 0]                               # (Lk, dim) bf16
        vv = v_ref[0, 0]
        for h in range(n_heads):
            lo = h * d
            qh = qv[:, lo:lo + d].astype(jnp.bfloat16)
            kh = kv[:, lo:lo + d]
            vh = vv[:, lo:lo + d]
            s = jax.lax.dot_general(qh, kh, (((1,), (1,)), ((), ())),
                                    preferred_element_type=jnp.float32)
            s = s - jnp.max(s, axis=-1, keepdims=True)
            p = jnp.exp(s)
            p = p / jnp.sum(p, axis=-1, keepdims=True)   # exact division
            o_ref[0, :, lo:lo + d] = jnp.dot(
                p.astype(jnp.bfloat16), vh,
                preferred_element_type=jnp.float32).astype(o_ref.dtype)

    return pl.pallas_call(
        kernel,
        out_shape=jax.ShapeDtypeStruct((B, Lq, dim), jnp.bfloat16),
        grid=(B,),
        in_specs=[pl.BlockSpec((1, 1, Lq, dim), lambda b: (qi, b, 0, 0)),
                  pl.BlockSpec((1, 1, Lk, dim), lambda b: (ki, b, 0, 0)),
                  pl.BlockSpec((1, 1, Lk, dim), lambda b: (vi, b, 0, 0))],
        out_specs=pl.BlockSpec((1, Lq, dim), lambda b: (b, 0, 0)),
        compiler_params=pltpu.CompilerParams(dimension_semantics=("parallel",)),
    )(q_arr, k_arr, v_arr)


# ----------------------- fused LN + fc0 + GEGLU -----------------------

def pallas_fc0_geglu(x, wa, wb, ba, bb, *, ln=None, eps=1e-5):
    """out = (LN(x)@wa + ba) * GELU(LN(x)@wb + bb); the 8*dim tensor never
    reaches HBM and the preceding LayerNorm is fused into the prologue."""
    M, K = x.shape
    N = wa.shape[1]
    tm = _pick_tile(M, (256, 128, 64, 32, 16, 8))
    tn = _pick_tile(N, (512, 256, 128))
    has_ln = ln is not None

    inputs = [x.astype(jnp.bfloat16), wa.astype(jnp.bfloat16),
              wb.astype(jnp.bfloat16),
              ba.reshape(1, N).astype(jnp.float32),
              bb.reshape(1, N).astype(jnp.float32)]
    in_specs = [pl.BlockSpec((tm, K), lambda i, j: (i, 0)),
                pl.BlockSpec((K, tn), lambda i, j: (0, j)),
                pl.BlockSpec((K, tn), lambda i, j: (0, j)),
                pl.BlockSpec((1, tn), lambda i, j: (0, j)),
                pl.BlockSpec((1, tn), lambda i, j: (0, j))]
    if has_ln:
        g, b = ln
        inputs += [g.reshape(1, K).astype(jnp.float32),
                   b.reshape(1, K).astype(jnp.float32)]
        in_specs += [pl.BlockSpec((1, K), lambda i, j: (0, 0)),
                     pl.BlockSpec((1, K), lambda i, j: (0, 0))]

    def kernel(*refs):
        x_ref, wa_ref, wb_ref, ba_ref, bb_ref = refs[:5]
        pos = 5
        if has_ln:
            lg_ref, lb_ref = refs[5], refs[6]
            pos = 7
        o_ref = refs[pos]
        xv = x_ref[...].astype(jnp.float32)
        if has_ln:
            xv = _layernorm_f32(xv, lg_ref, lb_ref, eps)
        xb = xv.astype(jnp.bfloat16)
        a = jnp.dot(xb, wa_ref[...], preferred_element_type=jnp.float32) + ba_ref[...]
        h = jnp.dot(xb, wb_ref[...], preferred_element_type=jnp.float32) + bb_ref[...]
        # TODO(synk): PyTorch nn.GELU() defaults to exact erf; tanh approx used.
        g = 0.5 * h * (1.0 + jnp.tanh(0.7978845608028654 * (h + 0.044715 * h * h * h)))
        o_ref[...] = (a * g).astype(o_ref.dtype)

    return pl.pallas_call(
        kernel,
        out_shape=jax.ShapeDtypeStruct((M, N), jnp.bfloat16),
        grid=(M // tm, N // tn),
        in_specs=in_specs,
        out_specs=pl.BlockSpec((tm, tn), lambda i, j: (i, j)),
        compiler_params=pltpu.CompilerParams(
            dimension_semantics=("parallel", "parallel")),
    )(*inputs)


# ------------------------------ module forwards ------------------------------

def resnet_forward(p, x, t_emb, H, W):
    # x: (B, HW, Cin) bf16; t_emb: (B, 1280) f32
    res = x
    t = pallas_matmul(t_emb, p['time_w'].T, p['time_b'],
                      pre_silu=True, out_dtype=jnp.float32)           # (B, Cout)
    h = pallas_groupnorm(x, p['gn0_g'], p['gn0_b'], eps=1e-5, silu=True)
    h = conv2d_3x3(h, p['conv0_w'], p['conv0_b'], H, W, time_add=t)   # + time fused
    h = pallas_groupnorm(h, p['gn1_g'], p['gn1_b'], eps=1e-5, silu=True)
    if 'res_w' in p:
        res = conv2d_1x1(res, p['res_w'], p['res_b'])
    return conv2d_3x3(h, p['conv1_w'], p['conv1_b'], H, W, residual=res)  # + res fused


def cross_attention_forward(p, x_flat, B, Lq, kv, *, self_attn, ln):
    """x_flat: (B*Lq, dim) bf16 (pre-norm residual).  LayerNorm `ln` is fused
    into the q/k/v projection prologues; the packed projections avoid XLA
    slicing of the fused qkv / kv buffers."""
    dim = p['wq'].shape[0]
    if self_attn:
        w_stack = jnp.stack([p['wq'].T, p['wk'].T, p['wv'].T], axis=0)   # (3, dim, dim)
        qkv = pallas_proj_packed(x_flat, w_stack, ln=ln)                 # (3, B*Lq, dim)
        qkv = qkv.reshape(3, B, Lq, dim)
        o = pallas_attention(qkv, qkv, qkv, 0, 1, 2)
    else:
        Lk, dkv = kv.shape[1], kv.shape[2]
        qp = pallas_proj_packed(x_flat, p['wq'].T[None], ln=ln)          # (1, B*Lq, dim)
        w_kv = jnp.stack([p['wk'].T, p['wv'].T], axis=0)                 # (2, dkv, dim)
        kvp = pallas_proj_packed(kv.reshape(B * Lk, dkv), w_kv)          # (2, B*Lk, dim)
        o = pallas_attention(qp.reshape(1, B, Lq, dim),
                             kvp.reshape(2, B, Lk, dim),
                             kvp.reshape(2, B, Lk, dim), 0, 0, 1)
    o = pallas_matmul(o.reshape(B * Lq, dim), p['wo'].T, p['bo'],
                      residual=x_flat)
    return o                                                            # (B*Lq, dim)


def transformer_forward(p, q, kv, dim):
    # q: (B, HW, dim) bf16; kv: (B, Lk, 768) bf16
    B, HW, _ = q.shape
    res1 = q
    h = pallas_groupnorm(q, p['gn_g'], p['gn_b'], eps=1e-6, silu=False)
    h = conv2d_1x1(h, p['cnn_in_w'], p['cnn_in_b'])
    hf = h.reshape(B * HW, dim)
    hf = cross_attention_forward(p['att1'], hf, B, HW, None, self_attn=True,
                                 ln=(p['ln0_g'], p['ln0_b']))
    hf = cross_attention_forward(p['att2'], hf, B, HW, kv, self_attn=False,
                                 ln=(p['ln1_g'], p['ln1_b']))
    res2 = hf
    dh = p['fc0_w'].shape[0] // 2
    g = pallas_fc0_geglu(hf, p['fc0_w'][:dh].T, p['fc0_w'][dh:].T,
                         p['fc0_b'][:dh], p['fc0_b'][dh:],
                         ln=(p['ln2_g'], p['ln2_b']))                   # (B*HW, 4*dim)
    hf = pallas_matmul(g, p['fc1_w'].T, p['fc1_b'], residual=res2)
    h = hf.reshape(B, HW, dim)
    return conv2d_1x1(h, p['cnn_out_w'], p['cnn_out_b'], residual=res1)


def upblock_forward(p, x, out_encoder, t_emb, out_down, dim_out, H, W):
    # x / out_down: (B, HW, C) bf16 ; out_encoder: (B, Lk, 768) bf16
    # TODO(synk): the channel concats below are still XLA HBM round trips;
    # passing the skip as a second K-segment into groupnorm/conv would fuse them.
    out_down = list(out_down)
    x = jnp.concatenate([x, out_down.pop()], axis=-1)
    x = resnet_forward(p['res0'], x, t_emb, H, W)
    x = transformer_forward(p['tf0'], x, out_encoder, dim_out)
    x = jnp.concatenate([x, out_down.pop()], axis=-1)
    x = resnet_forward(p['res1'], x, t_emb, H, W)
    x = transformer_forward(p['tf1'], x, out_encoder, dim_out)
    x = jnp.concatenate([x, out_down.pop()], axis=-1)
    x = resnet_forward(p['res2'], x, t_emb, H, W)
    x = transformer_forward(p['tf2'], x, out_encoder, dim_out)
    if 'out_conv_w' in p:
        # TODO(synk): fold the nearest-2x upsample into the conv's in-kernel
        # gather (currently materialized in XLA at the largest resolution).
        B = x.shape[0]
        x4 = x.reshape(B, H, W, dim_out)
        x4 = jnp.repeat(jnp.repeat(x4, 2, axis=1), 2, axis=2)
        x = x4.reshape(B, 4 * H * W, dim_out)
        x = conv2d_3x3(x, p['out_conv_w'], p['out_conv_b'], 2 * H, 2 * W)
        return x, 2 * H, 2 * W
    return x, H, W


def upblock_apply(p, out_vae_nchw, out_encoder, t_emb, out_down_nchw, dim_out):
    """NCHW f32 at the boundary, NHWC bf16 inside (single layout conversion)."""
    B, _, H, W = out_vae_nchw.shape

    def to_seq(a):
        return a.transpose(0, 2, 3, 1).reshape(a.shape[0], H * W,
                                               a.shape[1]).astype(jnp.bfloat16)

    x = to_seq(out_vae_nchw)
    downs = [to_seq(a) for a in out_down_nchw]
    enc = out_encoder.astype(jnp.bfloat16)
    y, Ho, Wo = upblock_forward(p, x, enc, t_emb, downs, dim_out, H, W)
    return (y.reshape(B, Ho, Wo, dim_out)
             .transpose(0, 3, 1, 2).astype(jnp.float32))


# ------------------------------ deterministic init ------------------------------

def _nrm(key, shape, scale=0.05):
    return scale * jax.random.normal(key, shape, jnp.float32)


def init_resnet(key, dim_in, dim_out):
    ks = jax.random.split(key, 7)
    p = {
        'time_w': _nrm(ks[0], (dim_out, 1280), 0.02),
        'time_b': _nrm(ks[1], (dim_out,), 0.02),
        'gn0_g': jnp.ones((dim_in,), jnp.float32),
        'gn0_b': jnp.zeros((dim_in,), jnp.float32),
        'conv0_w': _nrm(ks[2], (dim_out, dim_in, 3, 3)),
        'conv0_b': _nrm(ks[3], (dim_out,), 0.02),
        'gn1_g': jnp.ones((dim_out,), jnp.float32),
        'gn1_b': jnp.zeros((dim_out,), jnp.float32),
        'conv1_w': _nrm(ks[4], (dim_out, dim_out, 3, 3)),
        'conv1_b': _nrm(ks[5], (dim_out,), 0.02),
    }
    if dim_in != dim_out:
        k1, k2 = jax.random.split(ks[6])
        p['res_w'] = _nrm(k1, (dim_out, dim_in, 1, 1))
        p['res_b'] = _nrm(k2, (dim_out,), 0.02)
    return p


def init_cross_attention(key, dim_q, dim_kv):
    ks = jax.random.split(key, 5)
    return {
        'wq': _nrm(ks[0], (dim_q, dim_q)),
        'wk': _nrm(ks[1], (dim_q, dim_kv)),
        'wv': _nrm(ks[2], (dim_q, dim_kv)),
        'wo': _nrm(ks[3], (dim_q, dim_q)),
        'bo': _nrm(ks[4], (dim_q,), 0.02),
    }


def init_transformer(key, dim):
    ks = jax.random.split(key, 10)
    return {
        'gn_g': jnp.ones((dim,), jnp.float32), 'gn_b': jnp.zeros((dim,), jnp.float32),
        'cnn_in_w': _nrm(ks[0], (dim, dim, 1, 1)),
        'cnn_in_b': _nrm(ks[1], (dim,), 0.02),
        'ln0_g': jnp.ones((dim,), jnp.float32), 'ln0_b': jnp.zeros((dim,), jnp.float32),
        'att1': init_cross_attention(ks[2], dim, dim),
        'ln1_g': jnp.ones((dim,), jnp.float32), 'ln1_b': jnp.zeros((dim,), jnp.float32),
        'att2': init_cross_attention(ks[3], dim, 768),
        'ln2_g': jnp.ones((dim,), jnp.float32), 'ln2_b': jnp.zeros((dim,), jnp.float32),
        'fc0_w': _nrm(ks[4], (dim * 8, dim)),
        'fc0_b': _nrm(ks[5], (dim * 8,), 0.02),
        'fc1_w': _nrm(ks[6], (dim, dim * 4)),
        'fc1_b': _nrm(ks[7], (dim,), 0.02),
        'cnn_out_w': _nrm(ks[8], (dim, dim, 1, 1)),
        'cnn_out_b': _nrm(ks[9], (dim,), 0.02),
    }


def init_upblock(key, dim_in, dim_out, dim_prev, add_up):
    ks = jax.random.split(key, 8)
    p = {
        'res0': init_resnet(ks[0], dim_out + dim_prev, dim_out),
        'res1': init_resnet(ks[1], dim_out + dim_out, dim_out),
        'res2': init_resnet(ks[2], dim_in + dim_out, dim_out),
        'tf0': init_transformer(ks[3], dim_out),
        'tf1': init_transformer(ks[4], dim_out),
        'tf2': init_transformer(ks[5], dim_out),
    }
    if add_up:
        p['out_conv_w'] = _nrm(ks[6], (dim_out, dim_out, 3, 3))
        p['out_conv_b'] = _nrm(ks[7], (dim_out,), 0.02)
    return p


# ------------------------------------ main ------------------------------------

if __name__ == "__main__":
    key = jax.random.PRNGKey(0)
    B, H, W = 2, 8, 8
    dim_in = dim_out = dim_prev = 32        # channel counts multiple of 32 (GroupNorm groups)
    seq_enc = 8
    kp, k1, k2, k3, k4, k5, k6 = jax.random.split(key, 7)

    params = init_upblock(kp, dim_in, dim_out, dim_prev, add_up=True)
    out_vae = jax.random.normal(k1, (B, dim_prev, H, W), jnp.float32)
    out_encoder = jax.random.normal(k2, (B, seq_enc, 768), jnp.float32)
    t_emb = jax.random.normal(k3, (B, 1280), jnp.float32)
    out_down = [jax.random.normal(k4, (B, dim_in, H, W), jnp.float32),    # popped last
                jax.random.normal(k5, (B, dim_out, H, W), jnp.float32),
                jax.random.normal(k6, (B, dim_out, H, W), jnp.float32)]   # popped first

    y = upblock_apply(params, out_vae, out_encoder, t_emb, out_down, dim_out)
    y = jax.block_until_ready(y)
    assert y.shape == (B, dim_out, 2 * H, 2 * W), y.shape
    print("KERNEL_OK")
</pallas_src>

<mosaic_0001>
module attributes {stable_mosaic.version = 11 : i64} {
  func.func @kernel(%arg0: i32, %arg1: i32, %arg2: i32, %arg3: memref<2x256xbf16, #tpu.memory_space<vmem>>, %arg4: memref<256x32xbf16, #tpu.memory_space<vmem>>, %arg5: memref<1x32xf32, #tpu.memory_space<vmem>>, %arg6: memref<2x32xf32, #tpu.memory_space<vmem>>, %arg7: memref<2x32xf32, #tpu.memory_space<vmem>>) attributes {dimension_semantics = [#tpu.dimension_semantics<parallel>, #tpu.dimension_semantics<parallel>, #tpu.dimension_semantics<arbitrary>], iteration_bounds = array<i64: 1, 1, 5>, scalar_prefetch = 0 : i64, scratch_operands = 1 : i64, tpu.core_type = #tpu.core_type<tc>, window_params = [{transform_indices = @transform_0, window_bounds = array<i64: 2, 256>}, {transform_indices = @transform_1, window_bounds = array<i64: 256, 32>}, {transform_indices = @transform_2, window_bounds = array<i64: 1, 32>}, {transform_indices = @transform_3, window_bounds = array<i64: 2, 32>}]} {
    %c0_i32 = arith.constant 0 : i32
    %0 = arith.cmpi eq, %arg2, %c0_i32 : i32
    %1 = arith.extui %0 : i1 to i32
    %c0_i32_0 = arith.constant 0 : i32
    %2 = arith.cmpi ne, %1, %c0_i32_0 : i32
    scf.if %2 {
      %cst_14 = arith.constant 0.000000e+00 : f32
      %26 = vector.broadcast %cst_14 : f32 to vector<2x32xf32>
      %c0_15 = arith.constant 0 : index
      %c0_16 = arith.constant 0 : index
      %27 = vector.load %arg7[%c0_15, %c0_16] : memref<2x32xf32, #tpu.memory_space<vmem>>, vector<2x32xf32>
      tpu.vector_store %arg7[%c0_15, %c0_16], %26 {strides = array<i32>} : memref<2x32xf32, #tpu.memory_space<vmem>>, vector<2x32xf32>,
    } else {
    }
    %c0 = arith.constant 0 : index
    %c0_1 = arith.constant 0 : index
    %3 = vector.load %arg3[%c0, %c0_1] : memref<2x256xbf16, #tpu.memory_space<vmem>>, vector<2x256xbf16>
    %4 = arith.extf %3 : vector<2x256xbf16> to vector<2x256xf32>
    %cst = arith.constant -3.000000e+01 : f32
    %cst_2 = arith.constant 3.000000e+01 : f32
    %5 = vector.broadcast %cst : f32 to vector<2x256xf32>
    %6 = arith.maximumf %5, %4 : vector<2x256xf32>
    %7 = vector.broadcast %cst_2 : f32 to vector<2x256xf32>
    %8 = arith.minimumf %7, %6 : vector<2x256xf32>
    %cst_3 = arith.constant 0.000000e+00 : f32
    %9 = vector.broadcast %cst_3 : f32 to vector<2x256xf32>
    %10 = arith.subf %9, %8 : vector<2x256xf32>
    %11 = math.exp %10 : vector<2x256xf32>
    %cst_4 = arith.constant 1.000000e+00 : f32
    %12 = vector.broadcast %cst_4 : f32 to vector<2x256xf32>
    %13 = arith.addf %12, %11 : vector<2x256xf32>
    %cst_5 = arith.constant 1.000000e+00 : f32
    %14 = vector.broadcast %cst_5 : f32 to vector<2x256xf32>
    %15 = arith.divf %14, %13 : vector<2x256xf32>
    %16 = arith.mulf %4, %15 : vector<2x256xf32>
    %17 = arith.truncf %16 : vector<2x256xf32> to vector<2x256xbf16>
    %c0_6 = arith.constant 0 : index
    %c0_7 = arith.constant 0 : index
    %18 = vector.load %arg7[%c0_6, %c0_7] : memref<2x32xf32, #tpu.memory_space<vmem>>, vector<2x32xf32>
    %c0_8 = arith.constant 0 : index
    %c0_9 = arith.constant 0 : index
    %19 = vector.load %arg4[%c0_8, %c0_9] : memref<256x32xbf16, #tpu.memory_space<vmem>>, vector<256x32xbf16>
    %cst_10 = arith.constant dense<0.000000e+00> : vector<2x32xf32>
    %20 = tpu.matmul %17, %19, %cst_10 {dimension_numbers = #tpu.dot_dimension_numbers<[1], [0], [0], [1], [0, 0, 1, 1], [], []>} : vector<2x256xbf16>, vector<256x32xbf16>, vector<2x32xf32> -> vector<2x32xf32>
    %21 = arith.addf %18, %20 : vector<2x32xf32>
    %c0_11 = arith.constant 0 : index
    %c0_12 = arith.constant 0 : index
    %22 = vector.load %arg7[%c0_11, %c0_12] : memref<2x32xf32, #tpu.memory_space<vmem>>, vector<2x32xf32>
    tpu.vector_store %arg7[%c0_11, %c0_12], %21 {strides = array<i32>} : memref<2x32xf32, #tpu.memory_space<vmem>>, vector<2x32xf32>,
    %c4_i32 = arith.constant 4 : i32
    %23 = arith.cmpi eq, %arg2, %c4_i32 : i32
    %24 = arith.extui %23 : i1 to i32
    %c0_i32_13 = arith.constant 0 : i32
    %25 = arith.cmpi ne, %24, %c0_i32_13 : i32
    scf.if %25 {
      %c0_14 = arith.constant 0 : index
      %c0_15 = arith.constant 0 : index
      %26 = vector.load %arg7[%c0_14, %c0_15] : memref<2x32xf32, #tpu.memory_space<vmem>>, vector<2x32xf32>
      %c0_16 = arith.constant 0 : index
      %c0_17 = arith.constant 0 : index
      %27 = vector.load %arg5[%c0_16, %c0_17] : memref<1x32xf32, #tpu.memory_space<vmem>>, vector<1x32xf32>
      %28 = vector.broadcast %27 : vector<1x32xf32> to vector<2x32xf32>
      %29 = arith.addf %26, %28 : vector<2x32xf32>
      %c0_18 = arith.constant 0 : index
      %c0_19 = arith.constant 0 : index
      %30 = vector.load %arg6[%c0_18, %c0_19] : memref<2x32xf32, #tpu.memory_space<vmem>>, vector<2x32xf32>
      tpu.vector_store %arg6[%c0_18, %c0_19], %29 {strides = array<i32>} : memref<2x32xf32, #tpu.memory_space<vmem>>, vector<2x32xf32>,
    } else {
    }
    return
  }
  func.func @transform_0(%arg0: i32, %arg1: i32, %arg2: i32) -> (i32, i32) {
    %c0_i32 = arith.constant 0 : i32
    return %arg0, %arg2 : i32, i32
  }
  func.func @transform_1(%arg0: i32, %arg1: i32, %arg2: i32) -> (i32, i32) {
    %c0_i32 = arith.constant 0 : i32
    return %arg2, %arg1 : i32, i32
  }
  func.func @transform_2(%arg0: i32, %arg1: i32, %arg2: i32) -> (i32, i32) {
    %c0_i32 = arith.constant 0 : i32
    %c0_i32_0 = arith.constant 0 : i32
    return %c0_i32, %arg1 : i32, i32
  }
  func.func @transform_3(%arg0: i32, %arg1: i32, %arg2: i32) -> (i32, i32) {
    %c0_i32 = arith.constant 0 : i32
    return %arg0, %arg1 : i32, i32
  }
}

</mosaic_0001>

<bundles_post_ra>
// kernel: tpu_custom_call.1
= control target key start
LH: loop header
LB: loop body
LE: loop exit
PB: predicated region body
PF: predicated region fallthrough
CT: control target
= control target key end

     0   :  { %8 = vsyncpa [#allocation4], 0  ;;  %s736_s12 = smov 0   ;;  %s738_s13 = smov 0   ;;  %s817_s0 = inlined_call_operand.vmem [shape: bf16[2,1280], index: 0, kind: input, shape index: {}]   ;;  %s818_s1 = inlined_call_operand.vmem [shape: bf16[1280,32], index: 1, kind: input, shape index: {}]   ;;  %s819_s2 = inlined_call_operand.vmem [shape: f32[1,32], index: 2, kind: input, shape index: {}]   ;;  %s820_s3 = inlined_call_operand.hbm [shape: f32[2,32], index: 3, kind: output, shape index: {}]  }
   0x1   :  { %s740_s14 = smov 0  }
   0x2 LB: > { %s554_s15 = sadd.s32 4294967295, %s711_s14   ;;  %s26_s16 = sadd.s32 1, %s707_s13  ;;  %s711_s14 = sphi %s740_s14, %s14_s14   ;;  %s707_s13 = sphi %s738_s13, %s823_s13   ;;  %s703_s12 = sphi %s736_s12, %s822_s12  }
   0x3   : > { %p27_p0 = scmp.ge.s32.totalorder %s26_s16, 5  ;;  %p558_p1 = scmp.ge.s32.totalorder %s711_s14, 1 }
   0x4   : > { %p189_p2 = scmp.lt.s32.totalorder %s711_s14, 6 }
   0x5   : > { %s825_s16 = smov (%p27_p0, %s26_s16), 0 }
   0x6   : > { %p190_p3 = pnand %p558_p1, %p189_p2 }
   0x7   : > { %s559_s17 = sshll.u32 (!%p190_p3), %s703_s12, 1  ;;  %s560_s18 = sshll.u32 (!%p190_p3), %s703_s12, 5 }
   0x8   : > { %193 = sbr.rel (%p190_p3) target bundleno = 299 (0x12b), region = 32  ;;  %p225_p4 = scmp.lt.s32.totalorder (!%p190_p3), %s559_s17, 9 }
   0x9   : > { %p232_p5 = scmp.lt.s32.totalorder (!%p190_p3), %s560_s18, 159  ;;  %p562_p6 = scmp.ne.s32.totalorder (!%p190_p3), %s703_s12, 0 }
   0xd   : > { %s827_s17 = smov (!%p225_p4, %s559_s17), 9  ;;  %s829_s18 = smov (!%p232_p5, %s560_s18), 159 }
   0xe   : > { %s229_s21 = scalar_lea.vmem %s817_s0, %s827_s17  ;;  %s561_s22 = sshll.u32 %s829_s18, 2 }
   0xf   : > { %s768_s25 = scalar_lea.vmem %s818_s1, %s561_s22  ;;  %247 = sbr.rel (%p562_p6) target bundleno = 22 (0x16), region = 36 }
  0x14   : > { %vm248_vm0 = vcmask 254976   ;;  %v713_v0 = vmov 0.0  }
  0x15   : > { %249 = vst.msk [vmem:[#allocation2] sm:$0x3] %vm248_vm0, %v713_v0 }
  0x16 PF: > { %v641_v1 = vld [vmem:[%s768_s25 + $0x78] sm:$0xff]   ;;  %v643_v3 = vld [vmem:[%s768_s25 + $0x70] sm:$0xff]   ;;  %v645_v5 = vld [vmem:[%s768_s25 + $0x68] sm:$0xff]   ;;  %v714_v24 = vmov 1983009808   ;;  %v265_v26 = vlaneseq  ;;  %vm444_vm1 = vcmask 254976  }
  0x17   : > { %v642_v2 = vld [vmem:[%s768_s25 + $0x38] sm:$0xff]   ;;  %586 = vmatprep.subr.bf16.mxu0 %v641_v1  ;;  %v644_v4 = vld [vmem:[%s768_s25 + $0x30] sm:$0xff]   ;;  %v646_v6 = vld [vmem:[%s768_s25 + $0x28] sm:$0xff]   ;;  %v263_v25 = vunpack.c.l.s4 %v714_v24  ;;  %p580_p7 = scmp.ne.s32.totalorder %s703_s12, 4 }
  0x18   : > { %587 = vmatpush3.bf16.msra.mxu0 %v642_v2  ;;  %v647_v7 = vld [vmem:[%s768_s25 + $0x60] sm:$0xff]   ;;  %v649_v9 = vld [vmem:[%s768_s25 + $0x58] sm:$0xff]   ;;  %v651_v11 = vld [vmem:[%s768_s25 + $0x50] sm:$0xff]   ;;  %v266_v28 = vshrl.u32 %v265_v26, 7 }
  0x19   : > { %588 = vmatprep.subr.bf16.mxu0 %v643_v3  ;;  %v648_v8 = vld [vmem:[%s768_s25 + $0x20] sm:$0xff]   ;;  %v650_v10 = vld [vmem:[%s768_s25 + $0x18] sm:$0xff]   ;;  %v652_v14 = vld [vmem:[%s768_s25 + $0x10] sm:$0xff]   ;;  %v264_v27 = vunpack.c.0.s8 %v263_v25 }
  0x1a   : > { %v250_v12 = vld [vmem:[%s229_s21] sm:$0x3]  ;;  %v653_v16 = vld [vmem:[%s768_s25 + $0x48] sm:$0xff]  }
  0x1b   : > { %v251_v13 = vunpack.c.l.bf16 %v250_v12  ;;  %v654_v18 = vld [vmem:[%s768_s25 + $0x8] sm:$0xff]   ;;  %v655_v20 = vld [vmem:[%s768_s25 + $0x40] sm:$0xff]   ;;  %v267_v29 = vsub.s32 %v264_v27, %v266_v28 }
  0x1c   : > { %589 = vmatpush3.bf16.msra.mxu0 %v644_v4  ;;  %v656_v21 = vld [vmem:[%s768_s25] sm:$0xff]  }
  0x1d   : > { %590 = vmatprep.subr.bf16.mxu0 %v645_v5  ;;  %v563_v15 = vclamps-f32 %v251_v13, 30.0  ;;  %v274_v37 = vld [vmem:[#allocation2] sm:$0x3] }
  0x1f   : > { %v254_v17 = vsub.f32 0.0, %v563_v15 }
  0x20   : > { %591 = vmatpush3.bf16.msra.mxu0 %v646_v6 }
  0x21   : > { %592 = vmatprep.subr.bf16.mxu0 %v647_v7  ;;  %v255_v19 = vmul.f32 1.442695, %v254_v17 }
  0x23   : > { %657 = vpow2.f32 %v255_v19 }
  0x24   : > { %593 = vmatpush3.bf16.msra.mxu0 %v648_v8 }
  0x25   : > { %594 = vmatprep.subr.bf16.mxu0 %v649_v9 }
  0x28   : > { %595 = vmatpush3.bf16.msra.mxu0 %v650_v10 }
  0x29   : > { %596 = vmatprep.subr.bf16.mxu0 %v651_v11 }
  0x2c   : > { %597 = vmatpush3.bf16.msra.mxu0 %v652_v14 }
  0x2d   : > { %598 = vmatprep.subr.bf16.mxu0 %v653_v16 }
  0x30   : > { %599 = vmatpush3.bf16.msra.mxu0 %v654_v18  ;;  %v658_v22 = vpop.eup %657 }
  0x31   : > { %600 = vmatprep.subr.bf16.mxu0 %v655_v20  ;;  %v257_v23 = vadd.f32 1.0, %v658_v22 }
  0x33   : > { %659 = vrcp.f32 %v257_v23 }
  0x34   : > { %601 = vmatpush3.bf16.msra.mxu0 %v656_v21 }
  0x40   : > { %v660_v30 = vpop.eup %659 }
  0x41   : > { %v260_v31 = vmul.f32 %v660_v30, %v251_v13 }
  0x43   : > { %v268_v32 = vrot.slane %v260_v31, %v267_v29 }
  0x45   : > { %v269_v33 = vcombine.high %v268_v32, %v268_v32  ;;  %v272_v34 = vpack.c.bf16 %v268_v32, %v268_v32 }
  0x47   : > { %v273_v35 = vpack.c.bf16 %v269_v33, %v269_v33 }
  0x49   : > { %435 = vmatprep.mubr.bf16.mxu0 %v273_v35 }
  0x4a   : > { %436 = vmatmul.mubr.bf16.vlgmr.msra.gmra.mxu0 %v272_v34 }
 0x10a   : > { %v602_v36 = vpop.f32.mrf.mxu0 }
 0x10c   : > { %v603_v38 = vpop.f32.mrf.mxu0 }
 0x10d   : > { %v604_v39 = vadd.f32 %v603_v38, %v602_v36  ;;  %449 = sbr.rel (%p580_p7) target bundleno = 284 (0x11c), region = 40 }
 0x10e   : > { %v605_v40 = vpop.f32.mrf.mxu0 }
 0x10f   : > { %v443_v41 = vadd.f32 %v604_v39, %v274_v37 }
 0x110   : > { %v606_v42 = vpop.f32.mrf.mxu0 }
 0x111   : > { %445 = vst.msk [vmem:[#allocation2] sm:$0x3] %vm444_vm1, %v443_v41 }
 0x112   : > { %v581_v44 = vld [vmem:[%s819_s2] ss:$0 sm:$0xff] }
 0x118   : > { %v450_v43 = vld [vmem:[#allocation2] sm:$0x3] }
 0x119   : > { %v458_v45 = vadd.f32 %v581_v44, %v450_v43 }
 0x11b   : > { %459 = vst.msk [vmem:[#allocation3] sm:$0x3] %vm444_vm1, %v458_v45 }
 0x11c PF: > { %p793_p8 = scmp.eq.s32.totalorder %s554_s15, 4  ;;  %s715_s29 = smov [#allocation3]  }
 0x11d   : > { %s470_s30 = sshll.u32 %s715_s29, 4  ;;  %s471_s30 = int_to_ptr.vmem [resolvable:$true] %s470_s30 }
 0x11e   : > { %s661_s4 = scalar_lea.vmem %s471_s30, 32  ;;  %p668_p12 = scmp.lt.s32.totalorder %s471_s30, %s471_s30 }
 0x11f   : > { %p662_p9 = scmp.ne.s32.totalorder %s471_s30, %s661_s4  ;;  %p669_p13 = scmp.lt.s32.totalorder %s661_s4, %s661_s4 }
 0x121   : > { %p663_p10 = pnand %p662_p9, %p793_p8  ;;  %p670_p0 = por %p669_p13, %p668_p12 }
 0x123   : > { %p664_p11 = pneg %p663_p10 }
 0x125   : > { %p671_p1 = pnand %p670_p0, %p664_p11 }
 0x127   : > { %674 = shalt.err (!%p671_p1)
}
 0x128   : > { %609 = dma.vmem_to_hbm [thread:$0]  (%p793_p8), %s471_s30, 32, %s820_s3, [#allocation4]  }
 0x129   : > { %698 = dma.done.wait (%p793_p8), [#allocation4], 32  }
 0x12a   : > { %700 = vsyncadd (%p793_p8), [#allocation4], 4294967264 }
 0x12b PF: > { %s14_s14 = sadd.s32 1, %s711_s14   ;;  %s822_s12 = smov %s707_s13 }
 0x12c   : > { %p11_p2 = scmp.ge.s32.totalorder %s14_s14, 7   ;;  %s823_s13 = smov %s825_s16 }
 0x12e   :  { %13 = sbr.rel (!%p11_p2) target bundleno = 2 (0x2), region = 74 }
 0x133   :  { %483 = vsyncpa [#allocation4], 1 }
 0x134   :  { %485 = vsyncpa [#allocation4 + $0x1], 1 }

</bundles_post_ra>
